<compile_context>
chip_gen: v7x
topology: tpu7x:2x2x1
jax: 0.10.0
libtpu: 0.0.40
codegen_flags: <defaults>
</compile_context>

<pallas_src>
import jax
import jax.numpy as jnp
from jax import lax
from jax.experimental import pallas as pl
from jax.experimental.pallas import tpu as pltpu

L1 = 64       # sequence length (fixed by nn.LayerNorm((64, 50)))
OC1 = 50      # out_channel_1  (fixed by nn.LayerNorm((64, 50)))
LN_EPS = 1e-5


# ----------------------------------------------------------------------------
# Fused kernel: one grid step == one block of BB batch elements.
# ----------------------------------------------------------------------------
def symptom_attnet_kernel(xc_ref, lab_ref, wfc_ref, bfc_ref, wa3_ref,
                          ba_ref, pa_ref, gamma_ref, beta_ref, o_ref):
    xc = xc_ref[...]                                            # (BB, L1, OC1) f32
    bb, l1, oc1 = xc.shape
    n_rows = bb * l1

    # ---- label branch: one (BB,300)@(300,OC1) MXU dot + ReLU ----------------
    lab = jnp.dot(lab_ref[...].reshape(bb, -1), wfc_ref[...],
                  preferred_element_type=jnp.float32)           # (BB, OC1)
    lab = jnp.maximum(lab + bfc_ref[...], 0.0)

    # ---- channel gating ------------------------------------------------------
    xa = xc * lab[:, None, :]                                   # (BB, L1, OC1)

    # ---- Conv1d(OC1 -> 1, k=3, padding=1): one (BB*L1,OC1)@(OC1,3) MXU dot ---
    # p[r, k] = sum_c wa3[c, k] * xa[r, c]; the 3-tap combine is two sublane
    # shifts of a (BB*L1, 1) column with zero-pad masks at sequence boundaries.
    p = jnp.dot(xa.reshape(n_rows, oc1), wa3_ref[...],
                preferred_element_type=jnp.float32)             # (BB*L1, 3)
    seq = lax.broadcasted_iota(jnp.int32, (n_rows, 1), 0) % l1
    p_prev = pltpu.roll(p[:, 0:1], shift=1, axis=0)             # tap on x[t-1]
    p_prev = jnp.where(seq == 0, 0.0, p_prev)
    p_next = pltpu.roll(p[:, 2:3], shift=n_rows - 1, axis=0)    # tap on x[t+1]
    p_next = jnp.where(seq == l1 - 1, 0.0, p_next)
    s = p[:, 1:2] + p_prev + p_next + ba_ref[0, 0]              # (BB*L1, 1)

    # ---- PReLU ---------------------------------------------------------------
    alpha = pa_ref[0, 0]
    s = jnp.where(s >= 0.0, s, alpha * s)

    # ---- softmax over the sequence axis, per batch element -------------------
    s3 = s.reshape(bb, l1, 1)
    m = jnp.max(s3, axis=1, keepdims=True)                      # (BB, 1, 1)
    e = jnp.exp(s3 - m)
    denom = jnp.sum(e, axis=1, keepdims=True)                   # (BB, 1, 1)
    att = e * pl.reciprocal(denom, approx=True)                 # (BB, L1, 1)

    # ---- residual re-weighting + LayerNorm over the (L1, OC1) slab ------------
    y = xc + xc * att                                           # (BB, L1, OC1)
    inv_n = 1.0 / float(l1 * oc1)
    mean = jnp.sum(y, axis=(1, 2), keepdims=True) * inv_n       # (BB, 1, 1)
    yc = y - mean
    var = jnp.sum(yc * yc, axis=(1, 2), keepdims=True) * inv_n  # two-pass (matches ref)
    o_ref[...] = yc * lax.rsqrt(var + LN_EPS) * gamma_ref[...] + beta_ref[...]


def _pick_block_batch(b, target=64):
    """Batch block size: amortize per-step overhead but keep >= 2 grid steps."""
    if b <= 1:
        return 1
    return max(1, min(target, pl.cdiv(b, 2)))


def symptom_attnet(label_embed, x_conv, params, *, block_b=None):
    """label_embed: (B, 1, 300) or (B, 300); x_conv: (B, 64, 50) -> (B, 64, 50)."""
    B, l1, oc1 = x_conv.shape
    lab3 = label_embed.reshape(B, 1, 300).astype(jnp.float32)
    xcf = x_conv.astype(jnp.float32)

    bb = _pick_block_batch(B) if block_b is None else block_b
    n_blocks = pl.cdiv(B, bb)
    Bp = n_blocks * bb
    if Bp != B:                                   # pad batch to a block multiple
        xcf = jnp.pad(xcf, ((0, Bp - B), (0, 0), (0, 0)))
        lab3 = jnp.pad(lab3, ((0, Bp - B), (0, 0), (0, 0)))

    smem_scalar = pl.BlockSpec(memory_space=pltpu.MemorySpace.SMEM)

    out = pl.pallas_call(
        symptom_attnet_kernel,
        out_shape=jax.ShapeDtypeStruct((Bp, l1, oc1), jnp.float32),
        grid=(n_blocks,),
        in_specs=[
            pl.BlockSpec((bb, l1, oc1), lambda i: (i, 0, 0)),   # x_conv block
            pl.BlockSpec((bb, 1, 300), lambda i: (i, 0, 0)),    # label embed block
            pl.BlockSpec((300, oc1), lambda i: (0, 0)),         # fc weight (in,out)
            pl.BlockSpec((1, oc1), lambda i: (0, 0)),           # fc bias
            pl.BlockSpec((oc1, 3), lambda i: (0, 0)),           # conv1d taps (chan,k)
            smem_scalar,                                        # conv1d bias (1,1)
            smem_scalar,                                        # PReLU slope  (1,1)
            pl.BlockSpec((l1, oc1), lambda i: (0, 0)),          # LN gamma
            pl.BlockSpec((l1, oc1), lambda i: (0, 0)),          # LN beta
        ],
        out_specs=pl.BlockSpec((bb, l1, oc1), lambda i: (i, 0, 0)),
        compiler_params=pltpu.CompilerParams(
            dimension_semantics=("parallel",)),
    )(xcf, lab3, params["wfc"], params["bfc"], params["wa3"],
      params["ba"], params["pa"], params["gamma"], params["beta"])

    return out[:B] if Bp != B else out


# ----------------------------------------------------------------------------
# Pure-JAX reference (mirrors the PyTorch forward) for a correctness check.
# ----------------------------------------------------------------------------
def symptom_attnet_ref(label_embed, x_conv, p):
    B = x_conv.shape[0]
    lab = jnp.maximum(label_embed.reshape(B, 300) @ p["wfc"] + p["bfc"], 0.0)
    xa = x_conv * lab[:, None, :]
    xa_pad = jnp.pad(xa, ((0, 0), (1, 1), (0, 0)))
    s = (jnp.einsum("blc,c->bl", xa_pad[:, :-2], p["wa3"][:, 0])
         + jnp.einsum("blc,c->bl", xa_pad[:, 1:-1], p["wa3"][:, 1])
         + jnp.einsum("blc,c->bl", xa_pad[:, 2:], p["wa3"][:, 2])
         + p["ba"][0, 0])
    s = jnp.where(s >= 0.0, s, p["pa"][0, 0] * s)
    att = jax.nn.softmax(s, axis=1)[:, :, None]
    y = x_conv + x_conv * att
    mean = jnp.mean(y, axis=(1, 2), keepdims=True)
    var = jnp.mean((y - mean) ** 2, axis=(1, 2), keepdims=True)
    return (y - mean) / jnp.sqrt(var + LN_EPS) * p["gamma"] + p["beta"]


if __name__ == "__main__":
    B = 2                      # small demo batch; BB is picked so grid >= 2 steps

    root = jax.random.PRNGKey(0)
    kx, kl, kp = jax.random.split(root, 3)
    ks = iter(jax.random.split(kp, 8))

    def nrm(shape, scale=0.1):
        return (scale * jax.random.normal(next(ks), shape)).astype(jnp.float32)

    params = dict(
        wfc=nrm((300, OC1)),                        # Linear(300, OC1) weight^T
        bfc=nrm((1, OC1)),                          # Linear bias
        wa3=nrm((OC1, 3)),                          # Conv1d weight[0] as (OC1, 3)
        ba=nrm((1, 1)),                             # Conv1d bias
        pa=jnp.full((1, 1), 0.25, jnp.float32),     # PReLU default init
        gamma=(1.0 + nrm((L1, OC1))),               # LayerNorm affine
        beta=nrm((L1, OC1)),
    )

    label_embed = jax.random.normal(kl, (B, 1, 300), dtype=jnp.float32)
    # x_conv comes out of a ReLU'd conv in the parent model -> keep it >= 0
    x_conv = jnp.maximum(jax.random.normal(kx, (B, L1, OC1), dtype=jnp.float32), 0.0)

    fwd = jax.jit(symptom_attnet)
    out = jax.block_until_ready(fwd(label_embed, x_conv, params))
    ref = symptom_attnet_ref(label_embed, x_conv, params)

    assert out.shape == (B, L1, OC1), out.shape
    assert bool(jnp.all(jnp.isfinite(out)))
    assert bool(jnp.allclose(out, ref, atol=1e-3, rtol=1e-3)), \
        float(jnp.max(jnp.abs(out - ref)))
    print("KERNEL_OK")
</pallas_src>

<mosaic_0001>
module attributes {stable_mosaic.version = 11 : i64} {
  func.func @symptom_attnet_kernel(%arg0: i32, %arg1: memref<1x64x50xf32, #tpu.memory_space<vmem>>, %arg2: memref<1x1x300xf32, #tpu.memory_space<vmem>>, %arg3: memref<300x50xf32, #tpu.memory_space<vmem>>, %arg4: memref<1x50xf32, #tpu.memory_space<vmem>>, %arg5: memref<50x3xf32, #tpu.memory_space<vmem>>, %arg6: memref<1x1xf32, #tpu.memory_space<smem>>, %arg7: memref<1x1xf32, #tpu.memory_space<smem>>, %arg8: memref<64x50xf32, #tpu.memory_space<vmem>>, %arg9: memref<64x50xf32, #tpu.memory_space<vmem>>, %arg10: memref<1x64x50xf32, #tpu.memory_space<vmem>>) attributes {dimension_semantics = [#tpu.dimension_semantics<parallel>], iteration_bounds = array<i64: 2>, scalar_prefetch = 0 : i64, scratch_operands = 0 : i64, tpu.core_type = #tpu.core_type<tc>, window_params = [{transform_indices = @transform_0, window_bounds = array<i64: 1, 64, 50>}, {transform_indices = @transform_1, window_bounds = array<i64: 1, 1, 300>}, {pipeline_mode = #tpu.pipeline_mode<synchronous>, transform_indices = @transform_2, window_bounds = array<i64: 300, 50>}, {pipeline_mode = #tpu.pipeline_mode<synchronous>, transform_indices = @transform_3, window_bounds = array<i64: 1, 50>}, {pipeline_mode = #tpu.pipeline_mode<synchronous>, transform_indices = @transform_4, window_bounds = array<i64: 50, 3>}, {transform_indices = @transform_5, window_bounds = array<i64: 1, 1>}, {transform_indices = @transform_6, window_bounds = array<i64: 1, 1>}, {pipeline_mode = #tpu.pipeline_mode<synchronous>, transform_indices = @transform_7, window_bounds = array<i64: 64, 50>}, {pipeline_mode = #tpu.pipeline_mode<synchronous>, transform_indices = @transform_8, window_bounds = array<i64: 64, 50>}, {transform_indices = @transform_9, window_bounds = array<i64: 1, 64, 50>}]} {
    %c0 = arith.constant 0 : index
    %c0_0 = arith.constant 0 : index
    %c0_1 = arith.constant 0 : index
    %0 = vector.load %arg1[%c0, %c0_0, %c0_1] : memref<1x64x50xf32, #tpu.memory_space<vmem>>, vector<1x64x50xf32>
    %c0_2 = arith.constant 0 : index
    %c0_3 = arith.constant 0 : index
    %c0_4 = arith.constant 0 : index
    %1 = vector.load %arg2[%c0_2, %c0_3, %c0_4] : memref<1x1x300xf32, #tpu.memory_space<vmem>>, vector<1x1x300xf32>
    %2 = vector.shape_cast %1 : vector<1x1x300xf32> to vector<1x300xf32>
    %c0_5 = arith.constant 0 : index
    %c0_6 = arith.constant 0 : index
    %3 = vector.load %arg3[%c0_5, %c0_6] : memref<300x50xf32, #tpu.memory_space<vmem>>, vector<300x50xf32>
    %cst = arith.constant dense<0.000000e+00> : vector<1x50xf32>
    %4 = tpu.matmul %2, %3, %cst {dimension_numbers = #tpu.dot_dimension_numbers<[1], [0], [0], [1], [0, 0, 1, 1], [], []>} : vector<1x300xf32>, vector<300x50xf32>, vector<1x50xf32> -> vector<1x50xf32>
    %c0_7 = arith.constant 0 : index
    %c0_8 = arith.constant 0 : index
    %5 = vector.load %arg4[%c0_7, %c0_8] : memref<1x50xf32, #tpu.memory_space<vmem>>, vector<1x50xf32>
    %6 = arith.addf %4, %5 : vector<1x50xf32>
    %cst_9 = arith.constant 0.000000e+00 : f32
    %7 = vector.broadcast %cst_9 : f32 to vector<1x50xf32>
    %8 = arith.maximumf %6, %7 : vector<1x50xf32>
    %9 = vector.shape_cast %8 : vector<1x50xf32> to vector<1x1x50xf32>
    %10 = vector.broadcast %9 : vector<1x1x50xf32> to vector<1x64x50xf32>
    %11 = arith.mulf %0, %10 : vector<1x64x50xf32>
    %12 = vector.shape_cast %11 : vector<1x64x50xf32> to vector<64x50xf32>
    %c0_10 = arith.constant 0 : index
    %c0_11 = arith.constant 0 : index
    %13 = vector.load %arg5[%c0_10, %c0_11] : memref<50x3xf32, #tpu.memory_space<vmem>>, vector<50x3xf32>
    %cst_12 = arith.constant dense<0.000000e+00> : vector<64x3xf32>
    %14 = tpu.matmul %12, %13, %cst_12 {dimension_numbers = #tpu.dot_dimension_numbers<[1], [0], [0], [1], [0, 0, 1, 1], [], []>} : vector<64x50xf32>, vector<50x3xf32>, vector<64x3xf32> -> vector<64x3xf32>
    %15 = tpu.iota {dimensions = array<i32: 0>} : vector<64x1xi32>
    %c64_i32 = arith.constant 64 : i32
    %c0_i32 = arith.constant 0 : i32
    %16 = arith.cmpi eq, %c64_i32, %c0_i32 : i32
    %c1_i32 = arith.constant 1 : i32
    %17 = arith.select %16, %c1_i32, %c64_i32 : i32
    %18 = vector.broadcast %17 : i32 to vector<64x1xi32>
    %19 = arith.remsi %15, %18 : vector<64x1xi32>
    %c0_i32_13 = arith.constant 0 : i32
    %20 = vector.broadcast %c0_i32_13 : i32 to vector<64x1xi32>
    %21 = arith.cmpi ne, %19, %20 : vector<64x1xi32>
    %c0_i32_14 = arith.constant 0 : i32
    %22 = vector.broadcast %c0_i32_14 : i32 to vector<64x1xi32>
    %23 = arith.cmpi slt, %19, %22 : vector<64x1xi32>
    %c0_i32_15 = arith.constant 0 : i32
    %24 = arith.cmpi slt, %17, %c0_i32_15 : i32
    %25 = vector.broadcast %24 : i1 to vector<64x1xi1>
    %26 = vector.broadcast %25 : vector<64x1xi1> to vector<64x1xi1>
    %27 = arith.xori %23, %26 : vector<64x1xi1>
    %28 = arith.andi %27, %21 : vector<64x1xi1>
    %29 = vector.broadcast %17 : i32 to vector<64x1xi32>
    %30 = arith.addi %19, %29 : vector<64x1xi32>
    %31 = arith.select %28, %30, %19 : vector<64x1xi1>, vector<64x1xi32>
    %32 = vector.extract_strided_slice %14 {offsets = [0, 0], sizes = [64, 1], strides = [1, 1]} : vector<64x3xf32> to vector<64x1xf32>
    %c1_i32_16 = arith.constant 1 : i32
    %33 = tpu.dynamic_rotate %32 by %c1_i32_16 dim 0 : vector<64x1xf32>, i32 -> vector<64x1xf32>
    %c0_i32_17 = arith.constant 0 : i32
    %34 = vector.broadcast %c0_i32_17 : i32 to vector<64x1xi32>
    %35 = arith.cmpi eq, %31, %34 : vector<64x1xi32>
    %cst_18 = arith.constant 0.000000e+00 : f32
    %36 = vector.broadcast %cst_18 : f32 to vector<64x1xf32>
    %37 = arith.select %35, %36, %33 : vector<64x1xi1>, vector<64x1xf32>
    %38 = vector.extract_strided_slice %14 {offsets = [0, 2], sizes = [64, 1], strides = [1, 1]} : vector<64x3xf32> to vector<64x1xf32>
    %c63_i32 = arith.constant 63 : i32
    %39 = tpu.dynamic_rotate %38 by %c63_i32 dim 0 : vector<64x1xf32>, i32 -> vector<64x1xf32>
    %c63_i32_19 = arith.constant 63 : i32
    %40 = vector.broadcast %c63_i32_19 : i32 to vector<64x1xi32>
    %41 = arith.cmpi eq, %31, %40 : vector<64x1xi32>
    %cst_20 = arith.constant 0.000000e+00 : f32
    %42 = vector.broadcast %cst_20 : f32 to vector<64x1xf32>
    %43 = arith.select %41, %42, %39 : vector<64x1xi1>, vector<64x1xf32>
    %44 = vector.extract_strided_slice %14 {offsets = [0, 1], sizes = [64, 1], strides = [1, 1]} : vector<64x3xf32> to vector<64x1xf32>
    %45 = arith.addf %44, %37 : vector<64x1xf32>
    %46 = arith.addf %45, %43 : vector<64x1xf32>
    %c0_21 = arith.constant 0 : index
    %c0_22 = arith.constant 0 : index
    %47 = memref.load %arg6[%c0_21, %c0_22] : memref<1x1xf32, #tpu.memory_space<smem>>
    %48 = vector.broadcast %47 : f32 to vector<64x1xf32>
    %49 = arith.addf %46, %48 : vector<64x1xf32>
    %c0_23 = arith.constant 0 : index
    %c0_24 = arith.constant 0 : index
    %50 = memref.load %arg7[%c0_23, %c0_24] : memref<1x1xf32, #tpu.memory_space<smem>>
    %cst_25 = arith.constant 0.000000e+00 : f32
    %51 = vector.broadcast %cst_25 : f32 to vector<64x1xf32>
    %52 = arith.cmpf oge, %49, %51 : vector<64x1xf32>
    %53 = vector.broadcast %50 : f32 to vector<64x1xf32>
    %54 = arith.mulf %53, %49 : vector<64x1xf32>
    %55 = arith.select %52, %49, %54 : vector<64x1xi1>, vector<64x1xf32>
    %56 = vector.shape_cast %55 : vector<64x1xf32> to vector<1x64x1xf32>
    %cst_26 = arith.constant dense<0xFF800000> : vector<1x1xf32>
    %57 = vector.multi_reduction <maximumf>, %56, %cst_26 [1] : vector<1x64x1xf32> to vector<1x1xf32>
    %58 = vector.shape_cast %57 : vector<1x1xf32> to vector<1x1x1xf32>
    %59 = vector.broadcast %58 : vector<1x1x1xf32> to vector<1x64x1xf32>
    %60 = arith.subf %56, %59 : vector<1x64x1xf32>
    %61 = math.exp %60 : vector<1x64x1xf32>
    %cst_27 = arith.constant dense<0.000000e+00> : vector<1x1xf32>
    %62 = vector.multi_reduction <add>, %61, %cst_27 [1] : vector<1x64x1xf32> to vector<1x1xf32>
    %63 = vector.shape_cast %62 : vector<1x1xf32> to vector<1x1x1xf32>
    %64 = tpu.reciprocal %63 {approx = true} : vector<1x1x1xf32> -> vector<1x1x1xf32>
    %65 = vector.broadcast %64 : vector<1x1x1xf32> to vector<1x64x1xf32>
    %66 = arith.mulf %61, %65 : vector<1x64x1xf32>
    %67 = vector.broadcast %66 : vector<1x64x1xf32> to vector<1x64x50xf32>
    %68 = arith.mulf %0, %67 : vector<1x64x50xf32>
    %69 = arith.addf %0, %68 : vector<1x64x50xf32>
    %cst_28 = arith.constant dense<0.000000e+00> : vector<1xf32>
    %70 = vector.multi_reduction <add>, %69, %cst_28 [1, 2] : vector<1x64x50xf32> to vector<1xf32>
    %71 = vector.shape_cast %70 : vector<1xf32> to vector<1x1x1xf32>
    %cst_29 = arith.constant 3.125000e-04 : f32
    %72 = vector.broadcast %cst_29 : f32 to vector<1x1x1xf32>
    %73 = arith.mulf %71, %72 : vector<1x1x1xf32>
    %74 = vector.broadcast %73 : vector<1x1x1xf32> to vector<1x64x50xf32>
    %75 = arith.subf %69, %74 : vector<1x64x50xf32>
    %76 = arith.mulf %75, %75 : vector<1x64x50xf32>
    %cst_30 = arith.constant dense<0.000000e+00> : vector<1xf32>
    %77 = vector.multi_reduction <add>, %76, %cst_30 [1, 2] : vector<1x64x50xf32> to vector<1xf32>
    %78 = vector.shape_cast %77 : vector<1xf32> to vector<1x1x1xf32>
    %cst_31 = arith.constant 3.125000e-04 : f32
    %79 = vector.broadcast %cst_31 : f32 to vector<1x1x1xf32>
    %80 = arith.mulf %78, %79 : vector<1x1x1xf32>
    %cst_32 = arith.constant 9.99999974E-6 : f32
    %81 = vector.broadcast %cst_32 : f32 to vector<1x1x1xf32>
    %82 = arith.addf %80, %81 : vector<1x1x1xf32>
    %83 = math.rsqrt %82 : vector<1x1x1xf32>
    %84 = vector.broadcast %83 : vector<1x1x1xf32> to vector<1x64x50xf32>
    %85 = arith.mulf %75, %84 : vector<1x64x50xf32>
    %c0_33 = arith.constant 0 : index
    %c0_34 = arith.constant 0 : index
    %86 = vector.load %arg8[%c0_33, %c0_34] : memref<64x50xf32, #tpu.memory_space<vmem>>, vector<64x50xf32>
    %87 = vector.shape_cast %86 : vector<64x50xf32> to vector<1x64x50xf32>
    %88 = arith.mulf %85, %87 : vector<1x64x50xf32>
    %c0_35 = arith.constant 0 : index
    %c0_36 = arith.constant 0 : index
    %89 = vector.load %arg9[%c0_35, %c0_36] : memref<64x50xf32, #tpu.memory_space<vmem>>, vector<64x50xf32>
    %90 = vector.shape_cast %89 : vector<64x50xf32> to vector<1x64x50xf32>
    %91 = arith.addf %88, %90 : vector<1x64x50xf32>
    %c0_37 = arith.constant 0 : index
    %c0_38 = arith.constant 0 : index
    %c0_39 = arith.constant 0 : index
    %92 = vector.load %arg10[%c0_37, %c0_38, %c0_39] : memref<1x64x50xf32, #tpu.memory_space<vmem>>, vector<1x64x50xf32>
    tpu.vector_store %arg10[%c0_37, %c0_38, %c0_39], %91 {strides = array<i32>} : memref<1x64x50xf32, #tpu.memory_space<vmem>>, vector<1x64x50xf32>,
    return
  }
  func.func @transform_0(%arg0: i32) -> (i32, i32, i32) {
    %c0_i32 = arith.constant 0 : i32
    %c0_i32_0 = arith.constant 0 : i32
    %c0_i32_1 = arith.constant 0 : i32
    return %arg0, %c0_i32, %c0_i32_0 : i32, i32, i32
  }
  func.func @transform_1(%arg0: i32) -> (i32, i32, i32) {
    %c0_i32 = arith.constant 0 : i32
    %c0_i32_0 = arith.constant 0 : i32
    %c0_i32_1 = arith.constant 0 : i32
    return %arg0, %c0_i32, %c0_i32_0 : i32, i32, i32
  }
  func.func @transform_2(%arg0: i32) -> (i32, i32) {
    %c0_i32 = arith.constant 0 : i32
    %c0_i32_0 = arith.constant 0 : i32
    %c0_i32_1 = arith.constant 0 : i32
    return %c0_i32, %c0_i32_0 : i32, i32
  }
  func.func @transform_3(%arg0: i32) -> (i32, i32) {
    %c0_i32 = arith.constant 0 : i32
    %c0_i32_0 = arith.constant 0 : i32
    %c0_i32_1 = arith.constant 0 : i32
    return %c0_i32, %c0_i32_0 : i32, i32
  }
  func.func @transform_4(%arg0: i32) -> (i32, i32) {
    %c0_i32 = arith.constant 0 : i32
    %c0_i32_0 = arith.constant 0 : i32
    %c0_i32_1 = arith.constant 0 : i32
    return %c0_i32, %c0_i32_0 : i32, i32
  }
  func.func @transform_5(%arg0: i32) -> (i32, i32) {
    %c0_i32 = arith.constant 0 : i32
    %c0_i32_0 = arith.constant 0 : i32
    %c0_i32_1 = arith.constant 0 : i32
    return %c0_i32, %c0_i32_0 : i32, i32
  }
  func.func @transform_6(%arg0: i32) -> (i32, i32) {
    %c0_i32 = arith.constant 0 : i32
    %c0_i32_0 = arith.constant 0 : i32
    %c0_i32_1 = arith.constant 0 : i32
    return %c0_i32, %c0_i32_0 : i32, i32
  }
  func.func @transform_7(%arg0: i32) -> (i32, i32) {
    %c0_i32 = arith.constant 0 : i32
    %c0_i32_0 = arith.constant 0 : i32
    %c0_i32_1 = arith.constant 0 : i32
    return %c0_i32, %c0_i32_0 : i32, i32
  }
  func.func @transform_8(%arg0: i32) -> (i32, i32) {
    %c0_i32 = arith.constant 0 : i32
    %c0_i32_0 = arith.constant 0 : i32
    %c0_i32_1 = arith.constant 0 : i32
    return %c0_i32, %c0_i32_0 : i32, i32
  }
  func.func @transform_9(%arg0: i32) -> (i32, i32, i32) {
    %c0_i32 = arith.constant 0 : i32
    %c0_i32_0 = arith.constant 0 : i32
    %c0_i32_1 = arith.constant 0 : i32
    return %arg0, %c0_i32, %c0_i32_0 : i32, i32, i32
  }
}

</mosaic_0001>

<bundles_post_ra>
// kernel: symptom_attnet.1
= control target key start
LH: loop header
LB: loop body
LE: loop exit
PB: predicated region body
PF: predicated region fallthrough
CT: control target
= control target key end

     0   :  { %s1633_s13 = smov 0   ;;  %s2043_s0 = inlined_call_operand.vmem [shape: f32[2,64,50], index: 0, kind: input, shape index: {}]   ;;  %s2044_s1 = inlined_call_operand.vmem [shape: f32[2,1,300], index: 1, kind: input, shape index: {}]   ;;  %s2045_s2 = inlined_call_operand.vmem [shape: f32[300,50], index: 2, kind: input, shape index: {}]   ;;  %s2046_s3 = inlined_call_operand.vmem [shape: f32[1,50], index: 3, kind: input, shape index: {}]   ;;  %s2047_s4 = inlined_call_operand.vmem [shape: f32[50,3], index: 4, kind: input, shape index: {}]   ;;  %s2048_s5 = inlined_call_operand.<no memory space> [shape: f32[1,1], index: 5, kind: input, shape index: {}]   ;;  %s2049_s6 = inlined_call_operand.<no memory space> [shape: f32[1,1], index: 6, kind: input, shape index: {}]   ;;  %s2050_s7 = inlined_call_operand.vmem [shape: f32[64,50], index: 7, kind: input, shape index: {}]   ;;  %s2051_s8 = inlined_call_operand.vmem [shape: f32[64,50], index: 8, kind: input, shape index: {}]   ;;  %s2052_s9 = inlined_call_operand.vmem [shape: f32[2,64,50], index: 9, kind: output, shape index: {}]  }
   0x1   :  { %14 = sst [smem:[#allocation2]] %s2048_s5 }
   0x2   :  { %15 = sst [smem:[#allocation3]] %s2049_s6 }
   0x3 LB: > { %s1348_s14 = sadd.s32 4294967295, %s1568_s13   ;;  %p1352_p0 = scmp.ge.s32.totalorder %s1568_s13, 1  ;;  %s1568_s13 = sphi %s1633_s13, %s21_s13  }
   0x4   : > { %p298_p1 = scmp.lt.s32.totalorder %s1568_s13, 3 }
   0x6   : > { %p299_p2 = pnand %p1352_p0, %p298_p1 }
   0x7   : > { %v377_v0 = vld [vmem:[%s2045_s2 + $0x80] sm:$0xff] (!%p299_p2)  ;;  %v378_v1 = vld [vmem:[%s2045_s2 + $0x88] sm:$0xff] (!%p299_p2)  ;;  %p338_p3 = scmp.lt.s32.totalorder (!%p299_p2), %s1348_s14, 1  ;;  %v379_v5 = vld [vmem:[%s2045_s2 + $0x90] sm:$0xff] (!%p299_p2)  ;;  %v1570_v7 = vmov (!%p299_p2), 0.0|0.0   ;;  %v401_v8 = vlaneseq (!%p299_p2)  ;;  %vm1571_vm0 = vmmov (!%p299_p2), 0  }
   0x8   : > { %302 = sbr.rel (%p299_p2) target bundleno = 1319 (0x527), region = 56  ;;  %v361_v2 = vld [vmem:[%s2045_s2] sm:$0xff] (!%p299_p2)  ;;  %v1470_v3 = vpack.c.bf16 (!%p299_p2), %v378_v1, %v377_v0  ;;  %v362_v4 = vld [vmem:[%s2045_s2 + $0x8] sm:$0xff] (!%p299_p2)  ;;  %v380_v6 = vld [vmem:[%s2045_s2 + $0x98] sm:$0xff] (!%p299_p2)  ;;  %1502 = vmatprep.subr.bf16.mxu1 (!%p299_p2), %v1570_v7  ;;  %v1572_v14 = vmov (!%p299_p2), 0.0   ;;  %vm418_vm1 = vcmask (!%p299_p2), 1043456  }
   0x9   : > { %v1472_v9 = vpack.c.bf16 (!%p299_p2), %v362_v4, %v361_v2  ;;  %v1474_v10 = vpack.c.bf16 (!%p299_p2), %v380_v6, %v379_v5  ;;  %v363_v11 = vld [vmem:[%s2045_s2 + $0x10] sm:$0xff] (!%p299_p2)  ;;  %v364_v12 = vld [vmem:[%s2045_s2 + $0x18] sm:$0xff] (!%p299_p2)  ;;  %v381_v13 = vld [vmem:[%s2045_s2 + $0xa0] sm:$0xff] (!%p299_p2)  ;;  %1441 = vmatprep.mubr.msk.f32.mxu1 (!%p299_p2), %vm1571_vm0, %v1572_v14  ;;  %v1681_v20 = vshrl.u32 (!%p299_p2), %v401_v8, 7  ;;  %vm1573_vm2 = vmmov (!%p299_p2), 1   ;;  %s1574_s29 = smov (!%p299_p2), 126  }
   0xa   : > { %1471 = vmatprep.subr.bf16.mxu0 (!%p299_p2), %v1470_v3  ;;  %v382_v15 = vld [vmem:[%s2045_s2 + $0xa8] sm:$0xff] (!%p299_p2)  ;;  %v1476_v16 = vpack.c.bf16 (!%p299_p2), %v364_v12, %v363_v11  ;;  %v365_v18 = vld [vmem:[%s2045_s2 + $0x20] sm:$0xff] (!%p299_p2)  ;;  %v383_v21 = vld [vmem:[%s2045_s2 + $0xb0] sm:$0xff] (!%p299_p2)  ;;  %vm415_vm4 = vcmask (!%p299_p2), 359424   ;;  %vm607_vm5 = vcmask (!%p299_p2), 1041408   ;;  %vm582_vm6 = vcmask (!%p299_p2), 408576  }
   0xb   : > { %1473 = vmatpush3.bf16.msra.mxu0 (!%p299_p2), %v1472_v9  ;;  %v1478_v17 = vpack.c.bf16 (!%p299_p2), %v382_v15, %v381_v13  ;;  %v366_v19 = vld [vmem:[%s2045_s2 + $0x28] sm:$0xff] (!%p299_p2)  ;;  %v384_v22 = vld [vmem:[%s2045_s2 + $0xb8] sm:$0xff] (!%p299_p2)  ;;  %v367_v24 = vld [vmem:[%s2045_s2 + $0x30] sm:$0xff] (!%p299_p2)  ;;  %v407_v29 = vsub.s32 (!%p299_p2), 1, %v1681_v20  ;;  %v411_v46 = vsub.s32 (!%p299_p2), 2, %v1681_v20  ;;  %v403_v1 = vsub.s32 (!%p299_p2), 0, %v1681_v20 }
   0xc   : > { %1475 = vmatprep.subr.bf16.mxu0 (!%p299_p2), %v1474_v10  ;;  %v1480_v23 = vpack.c.bf16 (!%p299_p2), %v366_v19, %v365_v18  ;;  %v1482_v25 = vpack.c.bf16 (!%p299_p2), %v384_v22, %v383_v21  ;;  %v368_v26 = vld [vmem:[%s2045_s2 + $0x38] sm:$0xff] (!%p299_p2)  ;;  %v393_v27 = vld [vmem:[%s2045_s2 + $0x100] sm:$0xff] (!%p299_p2)  ;;  %v394_v28 = vld [vmem:[%s2045_s2 + $0x108] sm:$0xff] (!%p299_p2)  ;;  %vm829_vm7 = vcmp.lt.s32.totalorder (!%p299_p2), %v1681_v20, 1  ;;  %s1575_s30 = smov (!%p299_p2), 1   ;;  %vm894_vm9 = vcmp.lt.s32.totalorder (!%p299_p2), %v1681_v20, 7 }
   0xd   : > { %v385_v30 = vld [vmem:[%s2045_s2 + $0xc0] sm:$0xff] (!%p299_p2)  ;;  %v386_v31 = vld [vmem:[%s2045_s2 + $0xc8] sm:$0xff] (!%p299_p2)  ;;  %v1503_v32 = vpack.c.bf16 (!%p299_p2), %v394_v28, %v393_v27  ;;  %v395_v33 = vld [vmem:[%s2045_s2 + $0x110] sm:$0xff] (!%p299_p2)  ;;  %v1484_v35 = vpack.c.bf16 (!%p299_p2), %v368_v26, %v367_v24  ;;  %s1009_s11 = sld [smem:[#allocation3]] (!%p299_p2)  ;;  %vm1035_vm13 = vcmask (!%p299_p2), 15368  }
   0xe   : > { %v396_v34 = vld [vmem:[%s2045_s2 + $0x118] sm:$0xff] (!%p299_p2)  ;;  %v369_v36 = vld [vmem:[%s2045_s2 + $0x40] sm:$0xff] (!%p299_p2)  ;;  %v1486_v39 = vpack.c.bf16 (!%p299_p2), %v386_v31, %v385_v30  ;;  %v370_v40 = vld [vmem:[%s2045_s2 + $0x48] sm:$0xff] (!%p299_p2) }
   0xf   : > { %s2054_s14 = smov (!%p338_p3, %s1348_s14), 1  ;;  %1477 = vmatpush3.bf16.msra.mxu0 %v1476_v16  ;;  %1504 = vmatpush3.bf16.msra.mxu1 %v1503_v32  ;;  %v1506_v37 = vpack.c.bf16 %v396_v34, %v395_v33  ;;  %v397_v42 = vld [vmem:[%s2045_s2 + $0x120] sm:$0xff]  ;;  %v398_v43 = vld [vmem:[%s2045_s2 + $0x128] sm:$0xf]  ;;  %v387_v44 = vld [vmem:[%s2045_s2 + $0xd0] sm:$0xff]  ;;  %v1488_v47 = vpack.c.bf16 %v370_v40, %v369_v36 }
  0x10   : > { %s1524_s16 = smul.u32 3, %s2054_s14  ;;  %1479 = vmatprep.subr.bf16.mxu0 %v1478_v17  ;;  %1505 = vmatprep.subr.bf16.mxu1 %v1570_v7  ;;  %v388_v45 = vld [vmem:[%s2045_s2 + $0xd8] sm:$0xff]  ;;  %v1509_v48 = vpack.c.bf16 %v398_v43, %v397_v42  ;;  %v371_v50 = vld [vmem:[%s2045_s2 + $0x50] sm:$0xff]  ;;  %vm1510_vm3 = vmpackc.low %vm418_vm1, %vm1573_vm2  ;;  %s1370_s25 = sshll.u32 %s2054_s14, 6 }
  0x11   : > { %v1490_v49 = vpack.c.bf16 %v388_v45, %v387_v44  ;;  %v372_v51 = vld [vmem:[%s2045_s2 + $0x58] sm:$0xff]  ;;  %v389_v52 = vld [vmem:[%s2045_s2 + $0xe0] sm:$0xff]  ;;  %v390_v53 = vld [vmem:[%s2045_s2 + $0xe8] sm:$0xff]  ;;  %s342_s28 = scalar_lea.vmem %s2043_s0, %s1370_s25  ;;  %s351_s27 = scalar_lea.vmem %s2052_s9, %s1370_s25 }
  0x12   : > { %s346_s10 = scalar_lea.vmem %s2044_s1, %s1524_s16  ;;  %v1492_v55 = vpack.c.bf16 %v372_v51, %v371_v50  ;;  %v1494_v56 = vpack.c.bf16 %v390_v53, %v389_v52  ;;  %v373_v57 = vld [vmem:[%s2045_s2 + $0x60] sm:$0xff]  ;;  %v374_v58 = vld [vmem:[%s2045_s2 + $0x68] sm:$0xff]  ;;  %v391_v59 = vld [vmem:[%s2045_s2 + $0xf0] sm:$0xff] }
  0x13   : > { %1481 = vmatpush3.bf16.msra.mxu0 %v1480_v23  ;;  %v360_v38 = vld [vmem:[%s346_s10] sm:$0x7]  ;;  %1507 = vmatpush3.bf16.msra.mxu1 %v1506_v37  ;;  %v392_v60 = vld [vmem:[%s2045_s2 + $0xf8] sm:$0xff]  ;;  %v1496_v61 = vpack.c.bf16 %v374_v58, %v373_v57  ;;  %v375_v63 = vld [vmem:[%s2045_s2 + $0x70] sm:$0xff]  ;;  %s999_s10 = sld [smem:[#allocation2]] }
  0x14   : > { %1483 = vmatprep.subr.bf16.mxu0 %v1482_v25  ;;  %v408_v41 = vrot.slane %v360_v38, %v407_v29  ;;  %1508 = vmatprep.subr.bf16.mxu1 %v1570_v7  ;;  %v412_v54 = vrot.slane %v360_v38, %v411_v46  ;;  %v1498_v62 = vpack.c.bf16 %v392_v60, %v391_v59  ;;  %v376_v0 = vld [vmem:[%s2045_s2 + $0x78] sm:$0xff]  ;;  %v575_v4 = vld [vmem:[%s2047_s4] sm:$0xff]  ;;  %v576_v5 = vld [vmem:[%s2047_s4 + $0x8] sm:$0xff] }
  0x15   : > { %v1500_v2 = vpack.c.bf16 %v376_v0, %v375_v63  ;;  %v404_v3 = vrot.slane %v360_v38, %v403_v1  ;;  %v1512_v6 = vpack.c.bf16 %v576_v5, %v575_v4  ;;  %v577_v7 = vld [vmem:[%s2047_s4 + $0x10] sm:$0xff]  ;;  %v578_v8 = vld [vmem:[%s2047_s4 + $0x18] sm:$0xff]  ;;  %v579_v10 = vld [vmem:[%s2047_s4 + $0x20] sm:$0xff] }
  0x16   : > { %486 = vmatprep.mubr.f32.mxu0 %v408_v41  ;;  %v1516_v9 = vpack.c.bf16 %v578_v8, %v577_v7  ;;  %v580_v11 = vld [vmem:[%s2047_s4 + $0x28] sm:$0xff]  ;;  %v581_v13 = vld [vmem:[%s2047_s4 + $0x30] sm:$0x3]  ;;  %v399_v18 = vld [vmem:[%s2046_s3] sm:$0x1] }
  0x17   : > { %1485 = vmatpush3.bf16.msra.mxu0 %v1484_v35  ;;  %1511 = vmatpush3.bf16.msk.msra.mxu1 %vm1510_vm3, %v1509_v48  ;;  %v1520_v12 = vpack.c.bf16 %v580_v11, %v579_v10  ;;  %v1799_v24 = vld [vmem:[%s342_s28] sm:$0xff]  ;;  %v1801_v25 = vld [vmem:[%s342_s28 + $0x8] sm:$0xff]  ;;  %v1803_v27 = vld [vmem:[%s342_s28 + $0x10] sm:$0xff] }
  0x18   : > { %1487 = vmatprep.subr.bf16.mxu0 %v1486_v39  ;;  %1513 = vmatprep.subr.bf16.mxu1 %v1512_v6  ;;  %v1809_v31 = vld [vmem:[%s342_s28 + $0x18] sm:$0xff]  ;;  %v1812_v32 = vld [vmem:[%s342_s28 + $0x20] sm:$0xff]  ;;  %v1817_v35 = vld [vmem:[%s342_s28 + $0x28] sm:$0xff] }
  0x19   : > { %v1820_v36 = vld [vmem:[%s342_s28 + $0x30] sm:$0xff]  ;;  %v1825_v39 = vld [vmem:[%s342_s28 + $0x38] sm:$0xff] }
  0x1a   : > { %1442 = vmatmul.mubr.msk.f32.vlgmr.msra.gmra.mrb[0].mxu1 %vm415_vm4, %v412_v54 }
  0x1b   : > { %1489 = vmatpush3.bf16.msra.mxu0 %v1488_v47  ;;  %1515 = vmatpush3.bf16.msra.mxu1 %v1512_v6 }
  0x1c   : > { %1491 = vmatprep.subr.bf16.mxu0 %v1490_v49  ;;  %1517 = vmatprep.subr.bf16.mxu1 %v1516_v9 }
  0x1f   : > { %1493 = vmatpush3.bf16.msra.mxu0 %v1492_v55  ;;  %1519 = vmatpush3.bf16.msra.mxu1 %v1516_v9 }
  0x20   : > { %1495 = vmatprep.subr.bf16.mxu0 %v1494_v56  ;;  %1521 = vmatprep.subr.bf16.mxu1 %v1520_v12 }
  0x23   : > { %1497 = vmatpush3.bf16.msra.mxu0 %v1496_v61  ;;  %1523 = vmatpush3.bf16.msra.mxu1 %v1520_v12 }
  0x24   : > { %1499 = vmatprep.subr.bf16.mxu0 %v1498_v62  ;;  %1456 = vmatprep.subr.msk.mxu1 %vm607_vm5, %v581_v13 }
  0x27   : > { %1501 = vmatpush3.bf16.msra.mxu0 %v1500_v2  ;;  %1457 = vmatpush3.msk.msra.mxu1 %vm607_vm5, %v581_v13 }
  0x2a   : > { %487 = vmatmul.mubr.f32.vlgmr.msra.gmra.mrb[0].mxu0 %v404_v3 }
  0xed   : > { %v558_v14 = vpop.f32.mrb[0].mxu1 }
  0xee   : > { %v1443_v15 = vpop.f32.mrb[1].mxu1 }
  0xfd   : > { %v1404_v16 = vpop.f32.mrb[0].mxu0 }
  0xfe   : > { %v1405_v17 = vpop.f32.mrb[1].mxu0 }
  0xff   : > { %v1406_v19 = vadd.f32 %v1405_v17, %v1404_v16 }
 0x101   : > { %v489_v21 = vadd.f32 %v1406_v19, %v399_v18  ;;  %v724_v18 = vadd.s32 56, %v1681_v20 }
 0x103   : > { %v559_v22 = vadd.f32 %v558_v14, %v489_v21 }
 0x105   : > { %v562_v23 = vmax.f32 %v559_v22, 0.0 }
 0x107   : > { %v566_v26 = vrot.slane %v562_v23, %v403_v1  ;;  %v729_v1 = vand.u32 63, %v1681_v20  ;;  %v778_v23 = vand.u32 63, %v724_v18 }
 0x109   : > { %v567_v28 = vmul.f32 %v566_v26, %v1799_v24  ;;  %v568_v29 = vmul.f32 %v566_v26, %v1801_v25  ;;  %v569_v30 = vmul.f32 %v566_v26, %v1803_v27  ;;  %v570_v33 = vmul.f32 %v566_v26, %v1809_v31 }
 0x10a   : > { %v571_v34 = vmul.f32 %v566_v26, %v1812_v32  ;;  %v572_v37 = vmul.f32 %v566_v26, %v1817_v35  ;;  %v573_v38 = vmul.f32 %v566_v26, %v1820_v36  ;;  %v574_v40 = vmul.f32 %v566_v26, %v1825_v39 }
 0x10b   : > { %1458 = vmatprep.mubr.msk.f32.mxu1 %vm582_vm6, %v567_v28  ;;  %vm838_vm8 = vcmp.eq.s32.totalorder %v729_v1, 0  ;;  %vm910_vm10 = vcmp.eq.s32.totalorder %v778_v23, 63 }
 0x10c   : > { %1459 = vmatmul.mubr.msk.f32.vlgmr.msra.gmra.mrb[2].mxu1 %vm582_vm6, %v568_v29 }
 0x10d   : > { %1461 = vmatprep.mubr.msk.f32.mxu1 %vm582_vm6, %v569_v30 }
 0x110   : > { %1462 = vmatmul.mubr.msk.f32.gmra.mrb[4].mxu1 %vm582_vm6, %v570_v33 }
 0x111   : > { %1464 = vmatprep.mubr.msk.f32.mxu1 %vm582_vm6, %v571_v34 }
 0x114   : > { %1465 = vmatmul.mubr.msk.f32.gmra.mrb[6].mxu1 %vm582_vm6, %v572_v37 }
 0x115   : > { %1467 = vmatprep.mubr.msk.f32.mxu1 %vm582_vm6, %v573_v38  ;;  %v1576_v38 = vmov 1  }
 0x116   : > { %1541 = vset.pattern.permute.xlu1 %v1576_v38  ;;  %1540 = vset.pattern.permute.xlu0 %v1576_v38 }
 0x118   : > { %1468 = vmatmul.mubr.msk.f32.gmra.mrb[8].mxu1 %vm582_vm6, %v574_v40 }
 0x1df   : > { %v1831_v41 = vpop.f32.mrb[2].mxu1 }
 0x1e0   : > { %v822_v42 = vrot.slane %v1831_v41, 7  ;;  %864 = vrot.lane.b32.xlu1 %v1831_v41, %s1574_s29  ;;  %v1836_v43 = vpop.f32.mrb[3].mxu1 }
 0x1e1   : > { %v821_v44 = vrot.slane %v1836_v43, 7  ;;  %862 = vrot.lane.b32.xlu0 %v1836_v43, %s1574_s29 }
 0x1e3   : > { %v1842_v45 = vpop.f32.mrb[4].mxu1  ;;  %v836_v46 = vsel %vm829_vm7, %v821_v44, %v822_v42 }
 0x1e4   : > { %v824_v47 = vrot.slane %v1842_v45, 7  ;;  %v1847_v48 = vpop.f32.mrb[5].mxu1 }
 0x1e5   : > { %v823_v49 = vrot.slane %v1847_v48, 7  ;;  %868 = vrot.lane.b32.xlu0 %v1842_v45, %s1574_s29  ;;  %866 = vrot.lane.b32.xlu1 %v1847_v48, %s1574_s29 }
 0x1e7   : > { %v1854_v50 = vpop.f32.mrb[6].mxu1  ;;  %v835_v51 = vsel %vm829_vm7, %v822_v42, %v823_v49  ;;  %v834_v52 = vsel %vm829_vm7, %v823_v49, %v824_v47 }
 0x1e8   : > { %v826_v53 = vrot.slane %v1854_v50, 7  ;;  %v1861_v54 = vpop.f32.mrb[7].mxu1 }
 0x1e9   : > { %v825_v55 = vrot.slane %v1861_v54, 7  ;;  %870 = vrot.lane.b32.xlu1 %v1861_v54, %s1574_s29 }
 0x1eb   : > { %v1866_v56 = vpop.f32.mrb[8].mxu1  ;;  %v833_v57 = vsel %vm829_vm7, %v824_v47, %v825_v55  ;;  %v832_v58 = vsel %vm829_vm7, %v825_v55, %v826_v53 }
 0x1ec   : > { %v828_v59 = vrot.slane %v1866_v56, 7  ;;  %876 = vrot.lane.b32.xlu0 %v1866_v56, %s1574_s29  ;;  %v1875_v60 = vpop.f32.mrb[9].mxu1 }
 0x1ed   : > { %v827_v61 = vrot.slane %v1875_v60, 7  ;;  %874 = vrot.lane.b32.xlu1 %v1875_v60, %s1574_s29 }
 0x1ee   : > { %v837_v62 = vsel %vm829_vm7, %v828_v59, %v821_v44 }
 0x1ef   : > { %v830_v63 = vsel %vm829_vm7, %v827_v61, %v828_v59  ;;  %v831_v0 = vsel %vm829_vm7, %v826_v53, %v827_v61  ;;  %v846_v2 = vsel %vm838_vm8, 0.0, %v837_v62  ;;  %v1000_v61 = vstv %s999_s10 }
 0x1f0   : > { %872 = vrot.lane.b32.xlu0 %v1854_v50, %s1574_s29 }
 0x1f1   : > { %929 = vrot.lane.b32.xlu1 %v836_v46, %s1575_s30 }
 0x1f4   : > { %931 = vrot.lane.b32.xlu0 %v835_v51, %s1575_s30 }
 0x1f5   : > { %933 = vrot.lane.b32.xlu1 %v834_v52, %s1575_s30 }
 0x1f8   : > { %935 = vrot.lane.b32.xlu0 %v833_v57, %s1575_s30 }
 0x1f9   : > { %937 = vrot.lane.b32.xlu1 %v832_v58, %s1575_s30 }
 0x1fc   : > { %927 = vrot.lane.b32.xlu0 %v846_v2, %s1575_s30 }
 0x1fd   : > { %941 = vrot.lane.b32.xlu1 %v830_v63, %s1575_s30 }
 0x200   : > { %939 = vrot.lane.b32.xlu0 %v831_v0, %s1575_s30 }
 0x252   : > { %v865_v3 = vpop.permute.xlu1 %864 }
 0x253   : > { %v887_v4 = vrot.slane %v865_v3, 1  ;;  %v863_v5 = vpop.permute.xlu0 %862 }
 0x254   : > { %v886_v6 = vrot.slane %v863_v5, 1 }
 0x256   : > { %v901_v7 = vsel %vm894_vm9, %v886_v6, %v887_v4 }
 0x257   : > { %v869_v8 = vpop.permute.xlu0 %868  ;;  %v867_v9 = vpop.permute.xlu1 %866  ;;  %967 = vrot.lane.b32.xlu0 %v901_v7, %s1575_s30 }
 0x258   : > { %v889_v10 = vrot.slane %v869_v8, 1  ;;  %v888_v11 = vrot.slane %v867_v9, 1 }
 0x25a   : > { %v899_v12 = vsel %vm894_vm9, %v888_v11, %v889_v10  ;;  %v900_v13 = vsel %vm894_vm9, %v887_v4, %v888_v11 }
 0x25b   : > { %v871_v14 = vpop.permute.xlu1 %870  ;;  %971 = vrot.lane.b32.xlu0 %v899_v12, %s1575_s30  ;;  %969 = vrot.lane.b32.xlu1 %v900_v13, %s1575_s30 }
 0x25c   : > { %v890_v15 = vrot.slane %v871_v14, 1 }
 0x25e   : > { %v877_v16 = vpop.permute.xlu0 %876  ;;  %v898_v17 = vsel %vm894_vm9, %v889_v10, %v890_v15 }
 0x25f   : > { %973 = vrot.lane.b32.xlu1 %v898_v17, %s1575_s30  ;;  %v875_v19 = vpop.permute.xlu1 %874  ;;  %v893_v21 = vrot.slane %v877_v16, 1 }
 0x260   : > { %v892_v26 = vrot.slane %v875_v19, 1 }
 0x261   : > { %v902_v33 = vsel %vm894_vm9, %v893_v21, %v886_v6  ;;  %v1018_v6 = vstv %s1009_s11 }
 0x262   : > { %v873_v22 = vpop.permute.xlu0 %872  ;;  %v895_v34 = vsel %vm894_vm9, %v892_v26, %v893_v21  ;;  %v918_v37 = vsel %vm910_vm10, 0.0, %v902_v33 }
 0x263   : > { %v891_v28 = vrot.slane %v873_v22, 1  ;;  %v930_v42 = vpop.permute.xlu1 %929 }
 0x264   : > { %v952_v55 = vadd.f32 %v1831_v41, %v930_v42 }
 0x265   : > { %v897_v29 = vsel %vm894_vm9, %v890_v15, %v891_v28  ;;  %v896_v30 = vsel %vm894_vm9, %v891_v28, %v892_v26 }
 0x266   : > { %975 = vrot.lane.b32.xlu0 %v897_v29, %s1575_s30  ;;  %977 = vrot.lane.b32.xlu1 %v896_v30, %s1575_s30  ;;  %v932_v40 = vpop.permute.xlu0 %931 }
 0x267   : > { %v934_v46 = vpop.permute.xlu1 %933  ;;  %v953_v0 = vadd.f32 %v932_v40, %v1847_v48 }
 0x268   : > { %v954_v1 = vadd.f32 %v1842_v45, %v934_v46 }
 0x26a   : > { %979 = vrot.lane.b32.xlu0 %v895_v34, %s1575_s30  ;;  %981 = vrot.lane.b32.xlu1 %v918_v37, %s1575_s30  ;;  %v936_v44 = vpop.permute.xlu0 %935 }
 0x26b   : > { %v938_v49 = vpop.permute.xlu1 %937  ;;  %v955_v7 = vadd.f32 %v936_v44, %v1861_v54 }
 0x26c   : > { %v956_v41 = vadd.f32 %v1854_v50, %v938_v49 }
 0x26e   : > { %v928_v47 = vpop.permute.xlu0 %927 }
 0x26f   : > { %v942_v52 = vpop.permute.xlu1 %941  ;;  %v951_v57 = vadd.f32 %v928_v47, %v1836_v43 }
 0x270   : > { %v958_v45 = vadd.f32 %v1866_v56, %v942_v52 }
 0x272   : > { %v940_v51 = vpop.permute.xlu0 %939 }
 0x273   : > { %v957_v14 = vadd.f32 %v940_v51, %v1875_v60 }
 0x2c9   : > { %v968_v53 = vpop.permute.xlu0 %967 }
 0x2ca   : > { %v991_v58 = vadd.f32 %v968_v53, %v951_v57 }
 0x2cc   : > { %v1001_v2 = vadd.f32 %v1000_v61, %v991_v58 }
 0x2cd   : > { %v970_v20 = vpop.permute.xlu1 %969  ;;  %v972_v62 = vpop.permute.xlu0 %971 }
 0x2ce   : > { %v992_v59 = vadd.f32 %v970_v20, %v952_v55  ;;  %v993_v3 = vadd.f32 %v972_v62, %v953_v0  ;;  %v1019_v8 = vmul.f32 %v1018_v6, %v1001_v2  ;;  %vm1010_vm11 = vcmp.ge.f32.partialorder %v1001_v2, 0.0 }
 0x2d0   : > { %v1002_v4 = vadd.f32 %v1000_v61, %v992_v59  ;;  %v1003_v43 = vadd.f32 %v1000_v61, %v993_v3  ;;  %v1027_v54 = vsel %vm1010_vm11, %v1001_v2, %v1019_v8 }
 0x2d1   : > { %v974_v63 = vpop.permute.xlu1 %973  ;;  %v1036_v56 = vsel %vm1035_vm13, %v1027_v54, -inf }
 0x2d2   : > { %v994_v5 = vadd.f32 %v974_v63, %v954_v1  ;;  %v1020_v9 = vmul.f32 %v1018_v6, %v1002_v4  ;;  %vm1011_vm12 = vcmp.ge.f32.partialorder %v1002_v4, 0.0  ;;  %v1021_v17 = vmul.f32 %v1018_v6, %v1003_v43 }
 0x2d3   : > { %vm1012_vm0 = vcmp.ge.f32.partialorder %v1003_v43, 0.0 }
 0x2d4   : > { %v1004_v10 = vadd.f32 %v1000_v61, %v994_v5  ;;  %v1028_v50 = vsel %vm1011_vm12, %v1002_v4, %v1020_v9  ;;  %v1029_v40 = vsel %vm1012_vm0, %v1003_v43, %v1021_v17 }
 0x2d5   : > { %v1037_v60 = vsel %vm1035_vm13, %v1028_v50, -inf  ;;  %v1038_v20 = vsel %vm1035_vm13, %v1029_v40, -inf }
 0x2d6   : > { %v1022_v18 = vmul.f32 %v1018_v6, %v1004_v10  ;;  %vm1013_vm1 = vcmp.ge.f32.partialorder %v1004_v10, 0.0 }
 0x2d8   : > { %v976_v11 = vpop.permute.xlu0 %975  ;;  %v978_v12 = vpop.permute.xlu1 %977  ;;  %v1030_v42 = vsel %vm1013_vm1, %v1004_v10, %v1022_v18 }
 0x2d9   : > { %v995_v48 = vadd.f32 %v976_v11, %v955_v7  ;;  %v996_v13 = vadd.f32 %v978_v12, %v956_v41  ;;  %v1039_v55 = vsel %vm1035_vm13, %v1030_v42, -inf }
 0x2db   : > { %v1005_v15 = vadd.f32 %v1000_v61, %v995_v48  ;;  %v1006_v16 = vadd.f32 %v1000_v61, %v996_v13 }
 0x2dc   : > { %v980_v19 = vpop.permute.xlu0 %979  ;;  %v982_v21 = vpop.permute.xlu1 %981 }
 0x2dd   : > { %vm1014_vm14 = vcmp.ge.f32.partialorder %v1005_v15, 0.0  ;;  %v1023_v22 = vmul.f32 %v1018_v6, %v1005_v15  ;;  %vm1015_vm15 = vcmp.ge.f32.partialorder %v1006_v16, 0.0  ;;  %v1024_v23 = vmul.f32 %v1018_v6, %v1006_v16 }
 0x2de   : > { %v997_v26 = vadd.f32 %v980_v19, %v957_v14  ;;  %v998_v28 = vadd.f32 %v982_v21, %v958_v45 }
 0x2df   : > { %v1031_v29 = vsel %vm1014_vm14, %v1005_v15, %v1023_v22  ;;  %v1032_v30 = vsel %vm1015_vm15, %v1006_v16, %v1024_v23 }
 0x2e0   : > { %v1040_v33 = vsel %vm1035_vm13, %v1031_v29, -inf  ;;  %v1042_v34 = vsel %vm1035_vm13, %v1032_v30, -inf  ;;  %v1007_v37 = vadd.f32 %v1000_v61, %v997_v26  ;;  %v1008_v38 = vadd.f32 %v1000_v61, %v998_v28 }
 0x2e1   : > { %v1041_v44 = vmax.f32 %v1036_v56, %v1040_v33  ;;  %v1043_v46 = vmax.f32 %v1037_v60, %v1042_v34 }
 0x2e2   : > { %vm1016_vm2 = vcmp.ge.f32.partialorder %v1007_v37, 0.0  ;;  %v1025_v47 = vmul.f32 %v1018_v6, %v1007_v37  ;;  %vm1017_vm3 = vcmp.ge.f32.partialorder %v1008_v38, 0.0  ;;  %v1026_v49 = vmul.f32 %v1018_v6, %v1008_v38 }
 0x2e3   : > { %v1048_v51 = vmax.f32 %v1041_v44, %v1043_v46 }
 0x2e4   : > { %v1033_v52 = vsel %vm1016_vm2, %v1007_v37, %v1025_v47  ;;  %v1034_v53 = vsel %vm1017_vm3, %v1008_v38, %v1026_v49 }
 0x2e5   : > { %v1044_v57 = vsel %vm1035_vm13, %v1033_v52, -inf  ;;  %v1046_v58 = vsel %vm1035_vm13, %v1034_v53, -inf }
 0x2e6   : > { %v1045_v59 = vmax.f32 %v1038_v20, %v1044_v57  ;;  %v1047_v61 = vmax.f32 %v1039_v55, %v1046_v58 }
 0x2e8   : > { %v1049_v62 = vmax.f32 %v1045_v59, %v1047_v61 }
 0x2ea   : > { %v1050_v63 = vmax.f32 %v1048_v51, %v1049_v62 }
 0x2ec   : > { %v1051_v0 = vrot.slane %v1050_v63, 4 }
 0x2ee   : > { %v1052_v1 = vmax.f32 %v1050_v63, %v1051_v0 }
 0x2f0   : > { %v1053_v2 = vrot.slane %v1052_v1, 2 }
 0x2f2   : > { %v1054_v3 = vmax.f32 %v1052_v1, %v1053_v2 }
 0x2f4   : > { %v1055_v4 = vrot.slane %v1054_v3, 1 }
 0x2f6   : > { %v1056_v5 = vmax.f32 %v1054_v3, %v1055_v4 }
 0x2f8   : > { %v1064_v6 = vsub.f32 %v1034_v53, %v1056_v5  ;;  %v1057_v7 = vsub.f32 %v1027_v54, %v1056_v5  ;;  %v1058_v41 = vsub.f32 %v1028_v50, %v1056_v5  ;;  %v1059_v8 = vsub.f32 %v1029_v40, %v1056_v5 }
 0x2f9   : > { %v1060_v43 = vsub.f32 %v1030_v42, %v1056_v5  ;;  %v1061_v9 = vsub.f32 %v1031_v29, %v1056_v5  ;;  %v1062_v10 = vsub.f32 %v1032_v30, %v1056_v5  ;;  %v1063_v11 = vsub.f32 %v1033_v52, %v1056_v5 }
 0x2fa   : > { %v1065_v12 = vmul.f32 1.442695, %v1057_v7  ;;  %v1067_v48 = vmul.f32 1.442695, %v1058_v41  ;;  %v1069_v13 = vmul.f32 1.442695, %v1059_v8 }
 0x2fb   : > { %v1071_v45 = vmul.f32 1.442695, %v1060_v43  ;;  %v1073_v14 = vmul.f32 1.442695, %v1061_v9  ;;  %v1075_v15 = vmul.f32 1.442695, %v1062_v10 }
 0x2fc   : > { %1542 = vpow2.f32 %v1065_v12  ;;  %v1077_v16 = vmul.f32 1.442695, %v1063_v11  ;;  %v1079_v17 = vmul.f32 1.442695, %v1064_v6 }
 0x2fd   : > { %1544 = vpow2.f32 %v1067_v48 }
 0x2fe   : > { %1546 = vpow2.f32 %v1069_v13 }
 0x2ff   : > { %1548 = vpow2.f32 %v1071_v45 }
 0x300   : > { %1550 = vpow2.f32 %v1073_v14 }
 0x301   : > { %1552 = vpow2.f32 %v1075_v15 }
 0x302   : > { %1554 = vpow2.f32 %v1077_v16 }
 0x303   : > { %1556 = vpow2.f32 %v1079_v17 }
 0x306   : > { %v1543_v54 = vpop.eup %1542 }
 0x307   : > { %v1545_v50 = vpop.eup %1544  ;;  %v1081_v18 = vsel %vm1035_vm13, %v1543_v54, 0.0 }
 0x308   : > { %v1547_v19 = vpop.eup %1546  ;;  %v1082_v21 = vsel %vm1035_vm13, %v1545_v50, 0.0 }
 0x309   : > { %v1549_v22 = vpop.eup %1548  ;;  %v1083_v23 = vadd.f32 %v1082_v21, %v1081_v18  ;;  %v1084_v26 = vsel %vm1035_vm13, %v1547_v19, 0.0 }
 0x30a   : > { %v1551_v28 = vpop.eup %1550  ;;  %v1086_v60 = vsel %vm1035_vm13, %v1549_v22, 0.0 }
 0x30b   : > { %v1085_v56 = vadd.f32 %v1084_v26, %v1083_v23  ;;  %v1553_v29 = vpop.eup %1552  ;;  %v1088_v33 = vsel %vm1035_vm13, %v1551_v28, 0.0 }
 0x30c   : > { %v1555_v34 = vpop.eup %1554  ;;  %v1090_v38 = vsel %vm1035_vm13, %v1553_v29, 0.0 }
 0x30d   : > { %v1087_v30 = vadd.f32 %v1086_v60, %v1085_v56  ;;  %v1557_v40 = vpop.eup %1556  ;;  %v1092_v44 = vsel %vm1035_vm13, %v1555_v34, 0.0 }
 0x30e   : > { %v1094_v47 = vsel %vm1035_vm13, %v1557_v40, 0.0 }
 0x30f   : > { %v1089_v37 = vadd.f32 %v1088_v33, %v1087_v30 }
 0x311   : > { %v1091_v42 = vadd.f32 %v1090_v38, %v1089_v37 }
 0x313   : > { %v1093_v46 = vadd.f32 %v1092_v44, %v1091_v42 }
 0x315   : > { %v1095_v49 = vadd.f32 %v1094_v47, %v1093_v46 }
 0x317   : > { %v1096_v51 = vrot.slane %v1095_v49, 4 }
 0x319   : > { %v1097_v52 = vadd.f32 %v1096_v51, %v1095_v49 }
 0x31b   : > { %v1098_v53 = vrot.slane %v1097_v52, 2 }
 0x31d   : > { %v1099_v20 = vadd.f32 %v1098_v53, %v1097_v52 }
 0x31f   : > { %v1100_v55 = vrot.slane %v1099_v20, 1 }
 0x321   : > { %v1101_v57 = vadd.f32 %v1100_v55, %v1099_v20 }
 0x323   : > { %1558 = vrcp.f32 %v1101_v57 }
 0x32d   : > { %v1559_v58 = vpop.eup %1558 }
 0x32e   : > { %v1104_v59 = vmul.f32 %v1559_v58, %v1545_v50  ;;  %v1103_v61 = vmul.f32 %v1559_v58, %v1543_v54  ;;  %v1105_v62 = vmul.f32 %v1559_v58, %v1547_v19  ;;  %v1106_v63 = vmul.f32 %v1559_v58, %v1549_v22 }
 0x32f   : > { %v1107_v0 = vmul.f32 %v1559_v58, %v1551_v28  ;;  %v1108_v1 = vmul.f32 %v1559_v58, %v1553_v29  ;;  %v1109_v2 = vmul.f32 %v1559_v58, %v1555_v34  ;;  %v1110_v3 = vmul.f32 %v1559_v58, %v1557_v40 }
 0x330   : > { %1118 = vperm.xlu1 %1541, %v1104_v59   ;;  %1113 = vperm.xlu0 %1540, %v1103_v61  }
 0x334   : > { %1123 = vperm.xlu1 %1541, %v1105_v62   ;;  %1128 = vperm.xlu0 %1540, %v1106_v63  }
 0x338   : > { %1133 = vperm.xlu1 %1541, %v1107_v0   ;;  %1138 = vperm.xlu0 %1540, %v1108_v1  }
 0x33c   : > { %1143 = vperm.xlu1 %1541, %v1109_v2   ;;  %1148 = vperm.xlu0 %1540, %v1110_v3  }
 0x3af   : > { %v1119_v4 = vpop.permute.xlu1 %1118  ;;  %v1114_v5 = vpop.permute.xlu0 %1113 }
 0x3b0   : > { %v1152_v6 = vmul.f32 %v1119_v4, %v1801_v25  ;;  %v1151_v7 = vmul.f32 %v1114_v5, %v1799_v24 }
 0x3b2   : > { %v1160_v41 = vadd.f32 %v1152_v6, %v1801_v25  ;;  %v1159_v8 = vadd.f32 %v1151_v7, %v1799_v24 }
 0x3b3   : > { %v1124_v43 = vpop.permute.xlu1 %1123  ;;  %v1129_v9 = vpop.permute.xlu0 %1128 }
 0x3b4   : > { %v1168_v10 = vsel %vm582_vm6, %v1160_v41, 0.0  ;;  %v1167_v11 = vsel %vm582_vm6, %v1159_v8, 0.0  ;;  %v1153_v12 = vmul.f32 %v1124_v43, %v1803_v27  ;;  %v1154_v48 = vmul.f32 %v1129_v9, %v1809_v31 }
 0x3b5   : > { %v1169_v14 = vadd.f32 %v1168_v10, %v1167_v11 }
 0x3b6   : > { %v1161_v13 = vadd.f32 %v1153_v12, %v1803_v27  ;;  %v1162_v45 = vadd.f32 %v1154_v48, %v1809_v31 }
 0x3b7   : > { %v1134_v15 = vpop.permute.xlu1 %1133  ;;  %v1139_v16 = vpop.permute.xlu0 %1138 }
 0x3b8   : > { %v1170_v25 = vsel %vm582_vm6, %v1161_v13, 0.0  ;;  %v1155_v24 = vmul.f32 %v1134_v15, %v1812_v32  ;;  %v1156_v17 = vmul.f32 %v1139_v16, %v1817_v35  ;;  %v1172_v50 = vsel %vm582_vm6, %v1162_v45, 0.0 }
 0x3b9   : > { %v1171_v54 = vadd.f32 %v1170_v25, %v1169_v14 }
 0x3ba   : > { %v1163_v18 = vadd.f32 %v1155_v24, %v1812_v32  ;;  %v1164_v19 = vadd.f32 %v1156_v17, %v1817_v35 }
 0x3bb   : > { %v1173_v21 = vadd.f32 %v1172_v50, %v1171_v54  ;;  %v1144_v27 = vpop.permute.xlu1 %1143  ;;  %v1149_v22 = vpop.permute.xlu0 %1148 }
 0x3bc   : > { %v1174_v31 = vsel %vm582_vm6, %v1163_v18, 0.0  ;;  %v1157_v23 = vmul.f32 %v1144_v27, %v1820_v36  ;;  %v1158_v26 = vmul.f32 %v1149_v22, %v1825_v39  ;;  %v1176_v56 = vsel %vm582_vm6, %v1164_v19, 0.0  ;;  %v1243_v27 = vld [vmem:[%s2050_s7 + $0x10] sm:$0xff]  ;;  %v1244_v22 = vld [vmem:[%s2050_s7 + $0x18] sm:$0xff] }
 0x3bd   : > { %v1175_v28 = vadd.f32 %v1174_v31, %v1173_v21  ;;  %v1242_v21 = vld [vmem:[%s2050_s7 + $0x8] sm:$0xff] }
 0x3be   : > { %v1165_v60 = vadd.f32 %v1157_v23, %v1820_v36  ;;  %v1166_v29 = vadd.f32 %v1158_v26, %v1825_v39  ;;  %v1245_v23 = vld [vmem:[%s2050_s7 + $0x20] sm:$0xff]  ;;  %v1246_v26 = vld [vmem:[%s2050_s7 + $0x28] sm:$0xff] }
 0x3bf   : > { %v1177_v30 = vadd.f32 %v1176_v56, %v1175_v28  ;;  %v1247_v28 = vld [vmem:[%s2050_s7 + $0x30] sm:$0xff]  ;;  %v1248_v56 = vld [vmem:[%s2050_s7 + $0x38] sm:$0xff] }
 0x3c0   : > { %v1178_v32 = vsel %vm582_vm6, %v1165_v60, 0.0  ;;  %v1180_v33 = vsel %vm582_vm6, %v1166_v29, 0.0 }
 0x3c1   : > { %v1179_v35 = vadd.f32 %v1178_v32, %v1177_v30 }
 0x3c3   : > { %v1181_v34 = vadd.f32 %v1180_v33, %v1179_v35 }
 0x3c5   : > { %1182 = vadd.xlane.f32.xlu1 %v1181_v34  ;;  %v1259_v34 = vld [vmem:[%s2051_s8 + $0x10] sm:$0xff] }
 0x452   : > { %v1183_v37 = vpop.xlane.xlu1 %1182 }
 0x453   : > { %v1184_v38 = vrot.slane %v1183_v37, 4 }
 0x455   : > { %v1185_v40 = vadd.f32 %v1184_v38, %v1183_v37  ;;  %v1260_v37 = vld [vmem:[%s2051_s8 + $0x18] sm:$0xff]  ;;  %v1261_v38 = vld [vmem:[%s2051_s8 + $0x20] sm:$0xff] }
 0x457   : > { %v1186_v42 = vrot.slane %v1185_v40, 2 }
 0x459   : > { %v1187_v44 = vadd.f32 %v1186_v42, %v1185_v40 }
 0x45b   : > { %v1188_v46 = vrot.slane %v1187_v44, 1 }
 0x45d   : > { %v1189_v47 = vadd.f32 %v1188_v46, %v1187_v44 }
 0x45f   : > { %v1190_v49 = vmul.f32 0.0003125, %v1189_v47  ;;  %v1262_v47 = vld [vmem:[%s2051_s8 + $0x28] sm:$0xff] }
 0x461   : > { %v1191_v51 = vsub.f32 %v1159_v8, %v1190_v49  ;;  %v1192_v36 = vsub.f32 %v1160_v41, %v1190_v49  ;;  %v1193_v52 = vsub.f32 %v1161_v13, %v1190_v49  ;;  %v1194_v39 = vsub.f32 %v1162_v45, %v1190_v49 }
 0x462   : > { %v1195_v53 = vsub.f32 %v1163_v18, %v1190_v49  ;;  %v1196_v58 = vsub.f32 %v1164_v19, %v1190_v49  ;;  %v1197_v0 = vsub.f32 %v1165_v60, %v1190_v49  ;;  %v1198_v4 = vsub.f32 %v1166_v29, %v1190_v49  ;;  %v1241_v19 = vld [vmem:[%s2050_s7] sm:$0xff]  ;;  %v1258_v29 = vld [vmem:[%s2051_s8 + $0x8] sm:$0xff]  ;;  %v1263_v49 = vld [vmem:[%s2051_s8 + $0x30] sm:$0xff] }
 0x463   : > { %v1199_v20 = vmul.f32 %v1191_v51, %v1191_v51  ;;  %v1200_v55 = vmul.f32 %v1192_v36, %v1192_v36  ;;  %v1201_v57 = vmul.f32 %v1193_v52, %v1193_v52  ;;  %v1202_v59 = vmul.f32 %v1194_v39, %v1194_v39  ;;  %v1257_v60 = vld [vmem:[%s2051_s8] sm:$0xff] }
 0x464   : > { %v1203_v1 = vmul.f32 %v1195_v53, %v1195_v53  ;;  %v1204_v5 = vmul.f32 %v1196_v58, %v1196_v58  ;;  %v1205_v41 = vmul.f32 %v1197_v0, %v1197_v0  ;;  %v1206_v9 = vmul.f32 %v1198_v4, %v1198_v4 }
 0x465   : > { %v1207_v61 = vsel %vm582_vm6, %v1199_v20, 0.0  ;;  %v1208_v62 = vsel %vm582_vm6, %v1200_v55, 0.0  ;;  %v1210_v2 = vsel %vm582_vm6, %v1201_v57, 0.0  ;;  %v1212_v6 = vsel %vm582_vm6, %v1202_v59, 0.0 }
 0x466   : > { %v1209_v63 = vadd.f32 %v1208_v62, %v1207_v61  ;;  %v1214_v8 = vsel %vm582_vm6, %v1203_v1, 0.0  ;;  %v1216_v10 = vsel %vm582_vm6, %v1204_v5, 0.0  ;;  %v1218_v12 = vsel %vm582_vm6, %v1205_v41, 0.0 }
 0x467   : > { %v1220_v13 = vsel %vm582_vm6, %v1206_v9, 0.0 }
 0x468   : > { %v1211_v3 = vadd.f32 %v1210_v2, %v1209_v63 }
 0x46a   : > { %v1213_v7 = vadd.f32 %v1212_v6, %v1211_v3 }
 0x46c   : > { %v1215_v43 = vadd.f32 %v1214_v8, %v1213_v7 }
 0x46e   : > { %v1217_v11 = vadd.f32 %v1216_v10, %v1215_v43 }
 0x470   : > { %v1219_v48 = vadd.f32 %v1218_v12, %v1217_v11 }
 0x472   : > { %v1221_v45 = vadd.f32 %v1220_v13, %v1219_v48 }
 0x474   : > { %1222 = vadd.xlane.f32.xlu0 %v1221_v45 }
 0x501   : > { %v1223_v14 = vpop.xlane.xlu0 %1222 }
 0x502   : > { %v1224_v15 = vrot.slane %v1223_v14, 4 }
 0x504   : > { %v1225_v16 = vadd.f32 %v1224_v15, %v1223_v14 }
 0x506   : > { %v1226_v25 = vrot.slane %v1225_v16, 2 }
 0x508   : > { %v1227_v24 = vadd.f32 %v1226_v25, %v1225_v16 }
 0x50a   : > { %v1228_v17 = vrot.slane %v1227_v24, 1 }
 0x50c   : > { %v1229_v54 = vadd.f32 %v1228_v17, %v1227_v24 }
 0x50e   : > { %v1230_v50 = vmul.f32 0.0003125, %v1229_v54 }
 0x510   : > { %v1231_v18 = vadd.f32 1e-05, %v1230_v50 }
 0x512   : > { %1560 = vrsqrt.f32 %v1231_v18 }
 0x51c   : > { %v1561_v31 = vpop.eup %1560 }
 0x51d   : > { %v1233_v30 = vmul.f32 %v1561_v31, %v1191_v51  ;;  %v1234_v32 = vmul.f32 %v1561_v31, %v1192_v36  ;;  %v1235_v35 = vmul.f32 %v1561_v31, %v1193_v52  ;;  %v1236_v33 = vmul.f32 %v1561_v31, %v1194_v39  ;;  %v1264_v51 = vld [vmem:[%s2051_s8 + $0x38] sm:$0xff] }
 0x51e   : > { %v1237_v40 = vmul.f32 %v1561_v31, %v1195_v53  ;;  %v1238_v42 = vmul.f32 %v1561_v31, %v1196_v58  ;;  %v1239_v44 = vmul.f32 %v1561_v31, %v1197_v0  ;;  %v1240_v46 = vmul.f32 %v1561_v31, %v1198_v4 }
 0x51f   : > { %v1249_v36 = vmul.f32 %v1241_v19, %v1233_v30  ;;  %v1250_v52 = vmul.f32 %v1242_v21, %v1234_v32  ;;  %v1251_v39 = vmul.f32 %v1243_v27, %v1235_v35  ;;  %v1252_v20 = vmul.f32 %v1244_v22, %v1236_v33 }
 0x520   : > { %v1253_v53 = vmul.f32 %v1245_v23, %v1237_v40  ;;  %v1254_v55 = vmul.f32 %v1246_v26, %v1238_v42  ;;  %v1255_v57 = vmul.f32 %v1247_v28, %v1239_v44  ;;  %v1256_v58 = vmul.f32 %v1248_v56, %v1240_v46 }
 0x521   : > { %v1265_v59 = vadd.f32 %v1257_v60, %v1249_v36  ;;  %v1266_v61 = vadd.f32 %v1258_v29, %v1250_v52  ;;  %v1267_v62 = vadd.f32 %v1259_v34, %v1251_v39  ;;  %v1268_v63 = vadd.f32 %v1260_v37, %v1252_v20 }
 0x522   : > { %v1269_v0 = vadd.f32 %v1261_v38, %v1253_v53  ;;  %v1270_v1 = vadd.f32 %v1262_v47, %v1254_v55  ;;  %v1271_v2 = vadd.f32 %v1263_v49, %v1255_v57  ;;  %v1272_v3 = vadd.f32 %v1264_v51, %v1256_v58 }
 0x523   : > { %1273 = vst.msk [vmem:[%s351_s27] sm:$0xff] %vm582_vm6, %v1265_v59  ;;  %1274 = vst.msk [vmem:[%s351_s27 + $0x8] sm:$0xff] %vm582_vm6, %v1266_v61 }
 0x524   : > { %1275 = vst.msk [vmem:[%s351_s27 + $0x10] sm:$0xff] %vm582_vm6, %v1267_v62  ;;  %1276 = vst.msk [vmem:[%s351_s27 + $0x18] sm:$0xff] %vm582_vm6, %v1268_v63 }
 0x525   : > { %1277 = vst.msk [vmem:[%s351_s27 + $0x20] sm:$0xff] %vm582_vm6, %v1269_v0  ;;  %1278 = vst.msk [vmem:[%s351_s27 + $0x28] sm:$0xff] %vm582_vm6, %v1270_v1 }
 0x526   : > { %1279 = vst.msk [vmem:[%s351_s27 + $0x30] sm:$0xff] %vm582_vm6, %v1271_v2  ;;  %1280 = vst.msk [vmem:[%s351_s27 + $0x38] sm:$0xff] %vm582_vm6, %v1272_v3 }
 0x527 PF: > { %s21_s13 = sadd.s32 1, %s1568_s13  }
 0x528   : > { %p18_p4 = scmp.ge.s32.totalorder %s21_s13, 4  }
 0x52a   :  { %20 = sbr.rel (!%p18_p4) target bundleno = 3 (0x3), region = 89 }

</bundles_post_ra>
